<compile_context>
chip_gen: v6e
topology: v6e:2x2x1
jax: 0.10.0
libtpu: 0.0.40
codegen_flags: <defaults>
</compile_context>

<pallas_src>
import jax
import jax.numpy as jnp
from jax.experimental import pallas as pl
from jax.experimental.pallas import tpu as pltpu


def _round_up(x, m):
    return ((x + m - 1) // m) * m


# ----------------------------------------------------------------------------
# Kernels
# ----------------------------------------------------------------------------
def _linear_kernel_fused(x_ref, w_ref, b_ref, o_ref):
    """Single K step: o = x @ w + b in one pass (no accumulator needed)."""
    o_ref[...] = (
        jnp.dot(x_ref[...], w_ref[...], preferred_element_type=jnp.float32)
        + b_ref[...]
    ).astype(o_ref.dtype)


def _linear_kernel_acc(x_ref, w_ref, b_ref, o_ref):
    """K-tiled: accumulate directly into the resident f32 output block."""
    k = pl.program_id(2)

    @pl.when(k == 0)
    def _init():
        o_ref[...] = jnp.broadcast_to(b_ref[...], o_ref.shape).astype(o_ref.dtype)

    o_ref[...] += jnp.dot(
        x_ref[...], w_ref[...], preferred_element_type=jnp.float32
    )


# ----------------------------------------------------------------------------
# One-time parameter preparation (init-time, NOT the hot path)
# ----------------------------------------------------------------------------
def prepare_linear_params(w, b, *, tn_max=512, tk_max=1024):
    """Prepare nn.Linear params once.

    w: (IN, OUT)  == torch fc1.weight.T
    b: (OUT,) or (1, OUT)
    Pads W/b only if a dim exceeds the max tile size (done once here, so the
    per-call forward never rewrites the weight matrix in HBM).
    """
    IN, OUT = w.shape
    b = jnp.asarray(b).reshape(1, OUT)

    # Full-dim tiles (no (8,128) constraint) when small enough, else
    # lane-dense multiples of 128.
    tk = IN if IN <= tk_max else tk_max
    tn = OUT if OUT <= tn_max else tn_max
    IN_pad = IN if tk == IN else _round_up(IN, tk)
    OUT_pad = OUT if tn == OUT else _round_up(OUT, tn)

    w_p = w if (IN_pad, OUT_pad) == (IN, OUT) else jnp.pad(
        w, ((0, IN_pad - IN), (0, OUT_pad - OUT)))
    b_p = b if OUT_pad == OUT else jnp.pad(b, ((0, 0), (0, OUT_pad - OUT)))

    return dict(w=w_p, b=b_p, IN=IN, OUT=OUT, IN_pad=IN_pad, OUT_pad=OUT_pad,
                tn=tn, tk=tk)


# ----------------------------------------------------------------------------
# Forward (hot path)
# ----------------------------------------------------------------------------
def synthetic_model_forward(x, params, *, tm_max=256):
    """y = x @ w + b  (equivalent to torch fc1(x))."""
    B, IN = x.shape
    assert IN == params["IN"], "in_features mismatch"
    w_p, b_p = params["w"], params["b"]
    IN_pad, OUT_pad = params["IN_pad"], params["OUT_pad"]
    OUT, tn, tk = params["OUT"], params["tn"], params["tk"]

    tm = B if B <= tm_max else tm_max
    B_pad = B if tm == B else _round_up(B, tm)

    # Only the activation may need padding here; weights were padded at init.
    if (B_pad, IN_pad) != (B, IN):
        x_p = jnp.pad(x, ((0, B_pad - B), (0, IN_pad - IN)))
    else:
        x_p = x

    n_i, n_j, n_k = B_pad // tm, OUT_pad // tn, IN_pad // tk
    out_dtype = x.dtype
    itemsize = jnp.dtype(out_dtype).itemsize

    # VMEM: double-buffered input tiles + double-buffered output tile,
    # with headroom, never the full v7x physical 64 MiB.
    footprint = 2 * itemsize * (tm * tk + tk * tn + tn) + 2 * itemsize * tm * tn
    vmem_limit = int(min(48 * 1024 * 1024, max(32 * 1024 * 1024, 4 * footprint)))

    # Cost estimate with grid re-read factors (x read n_j times, w read n_i).
    bytes_accessed = itemsize * (
        B_pad * IN_pad * n_j + IN_pad * OUT_pad * n_i
        + B_pad * OUT_pad + OUT_pad * n_i)
    cost = pl.CostEstimate(flops=2 * B_pad * IN_pad * OUT_pad,
                           transcendentals=0,
                           bytes_accessed=int(bytes_accessed))

    if n_k == 1:
        # Fused single-K path (covers the toy 8x32x32 case with grid=(1,1),
        # no padding, no slicing, no accumulator).
        grid = (n_i, n_j)
        kernel = _linear_kernel_fused
        in_specs = [
            pl.BlockSpec((tm, tk), lambda i, j: (i, 0)),   # x tile
            pl.BlockSpec((tk, tn), lambda i, j: (0, j)),   # w tile
            pl.BlockSpec((1, tn), lambda i, j: (0, j)),    # bias tile
        ]
        out_spec = pl.BlockSpec((tm, tn), lambda i, j: (i, j))
        dims = ("parallel", "parallel")
    else:
        # K-tiled path accumulates into the f32 output block directly.
        assert out_dtype == jnp.float32, (
            "multi-K path accumulates in the f32 output block")
        grid = (n_i, n_j, n_k)
        kernel = _linear_kernel_acc
        in_specs = [
            pl.BlockSpec((tm, tk), lambda i, j, k: (i, k)),   # x tile
            pl.BlockSpec((tk, tn), lambda i, j, k: (k, j)),   # w tile
            pl.BlockSpec((1, tn), lambda i, j, k: (0, j)),    # bias tile
        ]
        out_spec = pl.BlockSpec((tm, tn), lambda i, j, k: (i, j))
        dims = ("parallel", "parallel", "arbitrary")

    out = pl.pallas_call(
        kernel,
        out_shape=jax.ShapeDtypeStruct((B_pad, OUT_pad), out_dtype),
        grid_spec=pltpu.PrefetchScalarGridSpec(
            num_scalar_prefetch=0,
            grid=grid,
            in_specs=in_specs,
            out_specs=out_spec,
        ),
        compiler_params=pltpu.CompilerParams(
            dimension_semantics=dims,
            vmem_limit_bytes=vmem_limit,
        ),
        cost_estimate=cost,
    )(x_p, w_p, b_p)

    if (B_pad, OUT_pad) != (B, OUT):
        out = out[:B, :OUT]
    return out


if __name__ == "__main__":
    # Shapes implied by the forward: fc1 = nn.Linear(IN, OUT), x: (B, IN)
    B, IN, OUT = 8, 32, 32

    key = jax.random.PRNGKey(0)
    kx, kw, kb = jax.random.split(key, 3)

    x = jax.random.normal(kx, (B, IN), dtype=jnp.float32)
    # Deterministic "fc1" params (torch-style uniform(-1/sqrt(IN), 1/sqrt(IN)))
    bound = 1.0 / (IN ** 0.5)
    w = jax.random.uniform(kw, (IN, OUT), dtype=jnp.float32,
                           minval=-bound, maxval=bound)  # == fc1.weight.T
    b = jax.random.uniform(kb, (OUT,), dtype=jnp.float32,
                           minval=-bound, maxval=bound)

    params = prepare_linear_params(w, b)          # one-time, init-side
    y = synthetic_model_forward(x, params)        # fused single-tile path
    jax.block_until_ready(y)

    y_ref = x @ w + b[None, :]
    assert y.shape == y_ref.shape
    assert jnp.allclose(y, y_ref, atol=1e-5, rtol=1e-5)

    # Also exercise the tiled (multi-N, multi-K) accumulator path once.
    B2, IN2, OUT2 = 96, 2048, 1024
    kx2, kw2, kb2 = jax.random.split(jax.random.PRNGKey(1), 3)
    x2 = jax.random.normal(kx2, (B2, IN2), dtype=jnp.float32)
    w2 = jax.random.normal(kw2, (IN2, OUT2), dtype=jnp.float32) * 0.02
    b2 = jax.random.normal(kb2, (OUT2,), dtype=jnp.float32)
    params2 = prepare_linear_params(w2, b2)
    y2 = synthetic_model_forward(x2, params2)
    jax.block_until_ready(y2)
    y2_ref = jax.lax.dot(x2, w2, precision=jax.lax.Precision.HIGHEST) + b2[None, :]
    assert jnp.allclose(y2, y2_ref, atol=1e-2, rtol=1e-2)

    print("KERNEL_OK")
</pallas_src>

<mosaic_0001>
module attributes {stable_mosaic.version = 11 : i64} {
  func.func @_linear_kernel_fused(%arg0: i32, %arg1: i32, %arg2: memref<8x32xf32, #tpu.memory_space<vmem>>, %arg3: memref<32x32xf32, #tpu.memory_space<vmem>>, %arg4: memref<1x32xf32, #tpu.memory_space<vmem>>, %arg5: memref<8x32xf32, #tpu.memory_space<vmem>>) attributes {dimension_semantics = [#tpu.dimension_semantics<parallel>, #tpu.dimension_semantics<parallel>], iteration_bounds = array<i64: 1, 1>, scalar_prefetch = 0 : i64, scratch_operands = 0 : i64, tpu.core_type = #tpu.core_type<tc>, window_params = [{transform_indices = @transform_0, window_bounds = array<i64: 8, 32>}, {transform_indices = @transform_1, window_bounds = array<i64: 32, 32>}, {transform_indices = @transform_2, window_bounds = array<i64: 1, 32>}, {transform_indices = @transform_3, window_bounds = array<i64: 8, 32>}]} {
    %c0 = arith.constant 0 : index
    %c0_0 = arith.constant 0 : index
    %0 = vector.load %arg2[%c0, %c0_0] : memref<8x32xf32, #tpu.memory_space<vmem>>, vector<8x32xf32>
    %c0_1 = arith.constant 0 : index
    %c0_2 = arith.constant 0 : index
    %1 = vector.load %arg3[%c0_1, %c0_2] : memref<32x32xf32, #tpu.memory_space<vmem>>, vector<32x32xf32>
    %cst = arith.constant dense<0.000000e+00> : vector<8x32xf32>
    %2 = tpu.matmul %0, %1, %cst {dimension_numbers = #tpu.dot_dimension_numbers<[1], [0], [0], [1], [0, 0, 1, 1], [], []>} : vector<8x32xf32>, vector<32x32xf32>, vector<8x32xf32> -> vector<8x32xf32>
    %c0_3 = arith.constant 0 : index
    %c0_4 = arith.constant 0 : index
    %3 = vector.load %arg4[%c0_3, %c0_4] : memref<1x32xf32, #tpu.memory_space<vmem>>, vector<1x32xf32>
    %4 = vector.broadcast %3 : vector<1x32xf32> to vector<8x32xf32>
    %5 = arith.addf %2, %4 : vector<8x32xf32>
    %c0_5 = arith.constant 0 : index
    %c0_6 = arith.constant 0 : index
    %6 = vector.load %arg5[%c0_5, %c0_6] : memref<8x32xf32, #tpu.memory_space<vmem>>, vector<8x32xf32>
    tpu.vector_store %arg5[%c0_5, %c0_6], %5 {strides = array<i32>} : memref<8x32xf32, #tpu.memory_space<vmem>>, vector<8x32xf32>,
    return
  }
  func.func @transform_0(%arg0: i32, %arg1: i32) -> (i32, i32) {
    %c0_i32 = arith.constant 0 : i32
    %c0_i32_0 = arith.constant 0 : i32
    return %arg0, %c0_i32 : i32, i32
  }
  func.func @transform_1(%arg0: i32, %arg1: i32) -> (i32, i32) {
    %c0_i32 = arith.constant 0 : i32
    %c0_i32_0 = arith.constant 0 : i32
    return %c0_i32, %arg1 : i32, i32
  }
  func.func @transform_2(%arg0: i32, %arg1: i32) -> (i32, i32) {
    %c0_i32 = arith.constant 0 : i32
    %c0_i32_0 = arith.constant 0 : i32
    return %c0_i32, %arg1 : i32, i32
  }
  func.func @transform_3(%arg0: i32, %arg1: i32) -> (i32, i32) {
    %c0_i32 = arith.constant 0 : i32
    return %arg0, %arg1 : i32, i32
  }
}

</mosaic_0001>

<bundles_post_ra>
// kernel: tpu_custom_call.1
= control target key start
LH: loop header
LB: loop body
LE: loop exit
PB: predicated region body
PF: predicated region fallthrough
CT: control target
= control target key end

     0   :  { %8 = vsyncpa [#allocation3], 0  ;;  %s274_s0 = inlined_call_operand.hbm [shape: f32[8,32], index: 0, kind: input, shape index: {}]   ;;  %s275_s1 = inlined_call_operand.hbm [shape: f32[32,32], index: 1, kind: input, shape index: {}]   ;;  %s276_s2 = inlined_call_operand.vmem [shape: f32[1,32], index: 2, kind: input, shape index: {}]   ;;  %s277_s3 = inlined_call_operand.hbm [shape: f32[8,32], index: 3, kind: output, shape index: {}]  }
   0x1   :  { %9 = vsyncpa [#allocation6], 0 }
   0x2   :  { %10 = vsyncpa [#allocation4], 0  ;;  %s235_s12 = smov [#allocation2]   ;;  %s236_s14 = smov [#allocation5]  }
   0x3   :  { %s17_s13 = sshll.u32 %s235_s12, 4  ;;  %s26_s15 = sshll.u32 %s236_s14, 4  ;;  %s18_s13 = int_to_ptr.vmem [resolvable:$true] %s17_s13  ;;  %s27_s15 = int_to_ptr.vmem [resolvable:$true] %s26_s15 }
   0x4   :  { %s177_s16 = scalar_lea.vmem %s18_s13, 128  ;;  %p182_p1 = scmp.lt.s32.totalorder %s18_s13, %s18_s13 }
   0x5   :  { %p178_p0 = scmp.ne.s32.totalorder %s18_s13, %s177_s16  ;;  %p183_p2 = scmp.lt.s32.totalorder %s177_s16, %s177_s16 }
   0x7   :  { %p184_p3 = por %p183_p2, %p182_p1 }
   0x9   :  { %p185_p4 = pnand %p184_p3, %p178_p0 }
   0xb   :  { %188 = shalt.err (!%p185_p4)
}
   0xc   :  { %20 = dma.hbm_to_vmem [thread:$0]  %s274_s0, 128, %s18_s13, [#allocation3]  }
   0xd   :  { %s197_s19 = scalar_lea.vmem %s27_s15, 512  ;;  %p202_p6 = scmp.lt.s32.totalorder %s27_s15, %s27_s15 }
   0xe   :  { %p198_p5 = scmp.ne.s32.totalorder %s27_s15, %s197_s19  ;;  %p203_p7 = scmp.lt.s32.totalorder %s197_s19, %s197_s19 }
  0x10   :  { %p204_p8 = por %p203_p7, %p202_p6 }
  0x12   :  { %p205_p9 = pnand %p204_p8, %p198_p5 }
  0x14   :  { %208 = shalt.err (!%p205_p9)
}
  0x15   :  { %s237_s20 = smov 128   ;;  %s238_s21 = smov 8  }
  0x16   :  { %32 = dma.hbm_to_vmem [thread:$0]  %s275_s1, 512, %s27_s15, [#allocation6], %s237_s20, %s237_s20, %s238_s21  }
  0x17   :  { %229 = dma.done.wait [#allocation3], 128  }
  0x18   :  { %230 = vsyncadd [#allocation3], 4294967168 }
  0x19   :  { %231 = dma.done.wait [#allocation6], 512  }
  0x1a   :  { %232 = vsyncadd [#allocation6], 4294966784  ;;  %v239_v0 = vmov 0.0   ;;  %vm240_vm0 = vmmov 0   ;;  %v45_v1 = vld [vmem:[#allocation5 + $0x18] sm:$0xff]  ;;  %v44_v2 = vld [vmem:[#allocation5 + $0x10] sm:$0xff] }
  0x1b   :  { %151 = vmatprep.subr.mxu0 %v239_v0  ;;  %159 = vmatprep.mubr.msk.f32.mxu0 %vm240_vm0, %v239_v0  ;;  %v43_v3 = vld [vmem:[#allocation5 + $0x8] sm:$0xff]  ;;  %v42_v4 = vld [vmem:[#allocation5] sm:$0xff]  ;;  %v41_v5 = vld [vmem:[#allocation2] sm:$0xff]  ;;  %vm53_vm1 = vcmask 261120   ;;  %s241_s24 = smov [#allocation7]  }
  0x1c   :  { %152 = vmatpush3.msra.mxu0 %v45_v1  ;;  %v144_v6 = vld [vmem:[%s276_s2] ss:$0 sm:$0xff]  ;;  %s134_s25 = sshll.u32 %s241_s24, 4  ;;  %s135_s25 = int_to_ptr.vmem [resolvable:$true] %s134_s25 }
  0x1d   :  { %153 = vmatprep.subr.mxu0 %v239_v0  ;;  %s209_s26 = scalar_lea.vmem %s135_s25, 128  ;;  %p214_p11 = scmp.lt.s32.totalorder %s135_s25, %s135_s25 }
  0x1e   :  { %154 = vmatpush3.msra.mxu0 %v44_v2  ;;  %p210_p10 = scmp.ne.s32.totalorder %s135_s25, %s209_s26  ;;  %p215_p12 = scmp.lt.s32.totalorder %s209_s26, %s209_s26 }
  0x1f   :  { %155 = vmatprep.subr.mxu0 %v239_v0 }
  0x20   :  { %156 = vmatpush3.msra.mxu0 %v43_v3  ;;  %p216_p13 = por %p215_p12, %p214_p11 }
  0x21   :  { %157 = vmatprep.subr.mxu0 %v239_v0 }
  0x22   :  { %158 = vmatpush3.msra.mxu0 %v42_v4  ;;  %p217_p0 = pnand %p216_p13, %p210_p10 }
  0x23   :  { %160 = vmatmul.mubr.msk.f32.vlgmr.msra.gmra.mxu0 %vm53_vm1, %v41_v5 }
  0xe3   :  { %v123_v7 = vpop.f32.mrf.mxu0 }
  0xe4   :  { %v124_v8 = vadd.f32 %v144_v6, %v123_v7 }
  0xe5   :  { %v161_v9 = vpop.f32.mrf.mxu0 }
  0xe6   :  { %127 = vst.msk [vmem:[#allocation7] sm:$0xff] %vm53_vm1, %v124_v8 }
  0xe7   :  { %220 = shalt.err (!%p217_p0)
}
  0xe8   :  { %137 = dma.vmem_to_hbm [thread:$0]  %s135_s25, 128, %s277_s3, [#allocation4]  }
  0xe9   :  { %233 = dma.done.wait [#allocation4], 128  }
  0xea   :  { %234 = vsyncadd [#allocation4], 4294967168 }
  0xeb   :  { %141 = vsyncpa [#allocation3], 1 }
  0xec   :  { %142 = vsyncpa [#allocation6], 1 }
  0xed   :  { %143 = vsyncpa [#allocation4], 1 }

</bundles_post_ra>
